<compile_context>
chip_gen: v7x
topology: tpu7x:2x2x1
jax: 0.10.0
libtpu: 0.0.40
codegen_flags: <defaults>
</compile_context>

<pallas_src>
import jax
import jax.numpy as jnp
from jax.experimental import pallas as pl
from jax.experimental.pallas import tpu as pltpu

LANE = 128


def _round_up(x, m):
    return ((x + m - 1) // m) * m


def mlp_kernel(x_ref, w1_ref, b1_ref, w2_ref, b2_ref, out_ref):
    # hidden = relu(x @ W1 + b1)   -- MXU matmul with f32 accumulation
    h = jnp.dot(x_ref[...], w1_ref[...], preferred_element_type=jnp.float32)
    h = jnp.maximum(h + b1_ref[...], 0.0)          # bias broadcast + ReLU in f32 (VPU)
    # predict = h @ W2 + b2 (no activation, matches forward())
    y = jnp.dot(h.astype(w2_ref.dtype), w2_ref[...],
                preferred_element_type=jnp.float32)
    out_ref[...] = (y + b2_ref[...]).astype(out_ref.dtype)


def net_forward(x, w1, b1, w2, b2, *, tile_b=512, compute_dtype=None):
    """2-layer MLP forward: relu(x @ w1 + b1) @ w2 + b2.

    x:  (B, n_feature) f32
    w1: (n_feature, n_hidden)    b1: (n_hidden,) or (1, n_hidden)
    w2: (n_hidden, n_output)     b2: (n_output,) or (1, n_output)
    Returns (B, n_output) float32.
    """
    B, n_feature = x.shape
    n_hidden = w1.shape[1]
    n_output = w2.shape[1]

    b1 = b1.reshape(1, n_hidden)
    b2 = b2.reshape(1, n_output)

    # Lane-dense padding of hidden/output dims to multiples of 128.
    # Zero-padded W1 columns -> h columns are relu(0 + 0) = 0; zero-padded W2
    # rows/cols contribute nothing, so the real output columns are exact.
    h_pad = _round_up(n_hidden, LANE)
    o_pad = _round_up(n_output, LANE)

    w1p = jnp.zeros((n_feature, h_pad), w1.dtype).at[:, :n_hidden].set(w1)
    b1p = jnp.zeros((1, h_pad), b1.dtype).at[:, :n_hidden].set(b1)
    w2p = jnp.zeros((h_pad, o_pad), w2.dtype).at[:n_hidden, :n_output].set(w2)
    b2p = jnp.zeros((1, o_pad), b2.dtype).at[:, :n_output].set(b2)

    if compute_dtype is not None:
        # e.g. jnp.bfloat16 on v6e/v7x for large hidden dims; accumulation stays f32.
        x = x.astype(compute_dtype)
        w1p = w1p.astype(compute_dtype)
        w2p = w2p.astype(compute_dtype)

    # Batch tiling: pad B to a multiple of the tile and run a 1-D grid over it.
    tb = min(tile_b, _round_up(B, 8))
    b_pad = _round_up(B, tb)
    if b_pad != B:
        x = jnp.zeros((b_pad, n_feature), x.dtype).at[:B, :].set(x)
    grid = (b_pad // tb,)

    flops = 2 * b_pad * (n_feature * h_pad + h_pad * o_pad)
    bytes_accessed = (
        x.size * x.dtype.itemsize
        + w1p.size * w1p.dtype.itemsize
        + w2p.size * w2p.dtype.itemsize
        + b_pad * o_pad * 4
    )

    out = pl.pallas_call(
        mlp_kernel,
        out_shape=jax.ShapeDtypeStruct((b_pad, o_pad), jnp.float32),
        grid=grid,
        in_specs=[
            pl.BlockSpec((tb, n_feature), lambda i: (i, 0)),     # batch-tiled x
            pl.BlockSpec((n_feature, h_pad), lambda i: (0, 0)),  # resident weights
            pl.BlockSpec((1, h_pad), lambda i: (0, 0)),
            pl.BlockSpec((h_pad, o_pad), lambda i: (0, 0)),
            pl.BlockSpec((1, o_pad), lambda i: (0, 0)),
        ],
        out_specs=pl.BlockSpec((tb, o_pad), lambda i: (i, 0)),
        compiler_params=pltpu.CompilerParams(
            dimension_semantics=("parallel",),  # shard batch across TCs (v7x)
        ),
        cost_estimate=pl.CostEstimate(
            flops=flops, transcendentals=0, bytes_accessed=bytes_accessed),
    )(x, w1p, b1p, w2p, b2p)

    # Strip batch + lane padding back to the logical shape.
    return out[:B, :n_output]


def init_linear_params(key, fan_in, fan_out):
    """Deterministic init mimicking torch.nn.Linear (uniform +/- 1/sqrt(fan_in)).
    Returns W as (fan_in, fan_out) (already transposed) and b as (1, fan_out)."""
    k_w, k_b = jax.random.split(key)
    bound = 1.0 / jnp.sqrt(jnp.float32(fan_in))
    w = jax.random.uniform(k_w, (fan_in, fan_out), jnp.float32, -bound, bound)
    b = jax.random.uniform(k_b, (1, fan_out), jnp.float32, -bound, bound)
    return w, b


if __name__ == "__main__":
    # Small shapes consistent with the module: Net(n_feature=4, n_hidden=32, n_output=2)
    batch, n_feature, n_hidden, n_output = 8, 4, 32, 2

    key = jax.random.PRNGKey(0)
    k_x, k_l1, k_l2 = jax.random.split(key, 3)

    x = jax.random.normal(k_x, (batch, n_feature), jnp.float32)
    w1, b1 = init_linear_params(k_l1, n_feature, n_hidden)
    w2, b2 = init_linear_params(k_l2, n_hidden, n_output)

    out = net_forward(x, w1, b1, w2, b2)
    out = jax.block_until_ready(out)

    # Reference check (plain JAX) to validate semantics.
    ref = jnp.maximum(x @ w1 + b1, 0.0) @ w2 + b2
    assert out.shape == (batch, n_output)
    assert jnp.allclose(out, ref, atol=1e-5, rtol=1e-5)

    print("KERNEL_OK")
</pallas_src>

<mosaic_0001>
module attributes {stable_mosaic.version = 11 : i64} {
  func.func @mlp_kernel(%arg0: i32, %arg1: memref<8x4xf32, #tpu.memory_space<vmem>>, %arg2: memref<4x128xf32, #tpu.memory_space<vmem>>, %arg3: memref<1x128xf32, #tpu.memory_space<vmem>>, %arg4: memref<128x128xf32, #tpu.memory_space<vmem>>, %arg5: memref<1x128xf32, #tpu.memory_space<vmem>>, %arg6: memref<8x128xf32, #tpu.memory_space<vmem>>) attributes {dimension_semantics = [#tpu.dimension_semantics<parallel>], iteration_bounds = array<i64: 1>, scalar_prefetch = 0 : i64, scratch_operands = 0 : i64, tpu.core_type = #tpu.core_type<tc>, window_params = [{transform_indices = @transform_0, window_bounds = array<i64: 8, 4>}, {pipeline_mode = #tpu.pipeline_mode<synchronous>, transform_indices = @transform_1, window_bounds = array<i64: 4, 128>}, {pipeline_mode = #tpu.pipeline_mode<synchronous>, transform_indices = @transform_2, window_bounds = array<i64: 1, 128>}, {pipeline_mode = #tpu.pipeline_mode<synchronous>, transform_indices = @transform_3, window_bounds = array<i64: 128, 128>}, {pipeline_mode = #tpu.pipeline_mode<synchronous>, transform_indices = @transform_4, window_bounds = array<i64: 1, 128>}, {transform_indices = @transform_5, window_bounds = array<i64: 8, 128>}]} {
    %c0 = arith.constant 0 : index
    %c0_0 = arith.constant 0 : index
    %0 = vector.load %arg1[%c0, %c0_0] : memref<8x4xf32, #tpu.memory_space<vmem>>, vector<8x4xf32>
    %c0_1 = arith.constant 0 : index
    %c0_2 = arith.constant 0 : index
    %1 = vector.load %arg2[%c0_1, %c0_2] : memref<4x128xf32, #tpu.memory_space<vmem>>, vector<4x128xf32>
    %cst = arith.constant dense<0.000000e+00> : vector<8x128xf32>
    %2 = tpu.matmul %0, %1, %cst {dimension_numbers = #tpu.dot_dimension_numbers<[1], [0], [0], [1], [0, 0, 1, 1], [], []>} : vector<8x4xf32>, vector<4x128xf32>, vector<8x128xf32> -> vector<8x128xf32>
    %c0_3 = arith.constant 0 : index
    %c0_4 = arith.constant 0 : index
    %3 = vector.load %arg3[%c0_3, %c0_4] : memref<1x128xf32, #tpu.memory_space<vmem>>, vector<1x128xf32>
    %4 = vector.broadcast %3 : vector<1x128xf32> to vector<8x128xf32>
    %5 = arith.addf %2, %4 : vector<8x128xf32>
    %cst_5 = arith.constant 0.000000e+00 : f32
    %6 = vector.broadcast %cst_5 : f32 to vector<8x128xf32>
    %7 = arith.maximumf %5, %6 : vector<8x128xf32>
    %c0_6 = arith.constant 0 : index
    %c0_7 = arith.constant 0 : index
    %8 = vector.load %arg4[%c0_6, %c0_7] : memref<128x128xf32, #tpu.memory_space<vmem>>, vector<128x128xf32>
    %cst_8 = arith.constant dense<0.000000e+00> : vector<8x128xf32>
    %9 = tpu.matmul %7, %8, %cst_8 {dimension_numbers = #tpu.dot_dimension_numbers<[1], [0], [0], [1], [0, 0, 1, 1], [], []>} : vector<8x128xf32>, vector<128x128xf32>, vector<8x128xf32> -> vector<8x128xf32>
    %c0_9 = arith.constant 0 : index
    %c0_10 = arith.constant 0 : index
    %10 = vector.load %arg5[%c0_9, %c0_10] : memref<1x128xf32, #tpu.memory_space<vmem>>, vector<1x128xf32>
    %11 = vector.broadcast %10 : vector<1x128xf32> to vector<8x128xf32>
    %12 = arith.addf %9, %11 : vector<8x128xf32>
    %c0_11 = arith.constant 0 : index
    %c0_12 = arith.constant 0 : index
    %13 = vector.load %arg6[%c0_11, %c0_12] : memref<8x128xf32, #tpu.memory_space<vmem>>, vector<8x128xf32>
    tpu.vector_store %arg6[%c0_11, %c0_12], %12 {strides = array<i32>} : memref<8x128xf32, #tpu.memory_space<vmem>>, vector<8x128xf32>,
    return
  }
  func.func @transform_0(%arg0: i32) -> (i32, i32) {
    %c0_i32 = arith.constant 0 : i32
    %c0_i32_0 = arith.constant 0 : i32
    return %arg0, %c0_i32 : i32, i32
  }
  func.func @transform_1(%arg0: i32) -> (i32, i32) {
    %c0_i32 = arith.constant 0 : i32
    %c0_i32_0 = arith.constant 0 : i32
    %c0_i32_1 = arith.constant 0 : i32
    return %c0_i32, %c0_i32_0 : i32, i32
  }
  func.func @transform_2(%arg0: i32) -> (i32, i32) {
    %c0_i32 = arith.constant 0 : i32
    %c0_i32_0 = arith.constant 0 : i32
    %c0_i32_1 = arith.constant 0 : i32
    return %c0_i32, %c0_i32_0 : i32, i32
  }
  func.func @transform_3(%arg0: i32) -> (i32, i32) {
    %c0_i32 = arith.constant 0 : i32
    %c0_i32_0 = arith.constant 0 : i32
    %c0_i32_1 = arith.constant 0 : i32
    return %c0_i32, %c0_i32_0 : i32, i32
  }
  func.func @transform_4(%arg0: i32) -> (i32, i32) {
    %c0_i32 = arith.constant 0 : i32
    %c0_i32_0 = arith.constant 0 : i32
    %c0_i32_1 = arith.constant 0 : i32
    return %c0_i32, %c0_i32_0 : i32, i32
  }
  func.func @transform_5(%arg0: i32) -> (i32, i32) {
    %c0_i32 = arith.constant 0 : i32
    %c0_i32_0 = arith.constant 0 : i32
    return %arg0, %c0_i32 : i32, i32
  }
}

</mosaic_0001>

<bundles_post_ra>
// kernel: tpu_custom_call.1
= control target key start
LH: loop header
LB: loop body
LE: loop exit
PB: predicated region body
PF: predicated region fallthrough
CT: control target
= control target key end

     0   :  { %10 = vsyncpa [#allocation3], 0  ;;  %s447_s0 = inlined_call_operand.vmem [shape: f32[8,4], index: 0, kind: input, shape index: {}]   ;;  %s448_s1 = inlined_call_operand.vmem [shape: f32[4,128], index: 1, kind: input, shape index: {}]   ;;  %s449_s2 = inlined_call_operand.vmem [shape: f32[1,128], index: 2, kind: input, shape index: {}]   ;;  %s450_s3 = inlined_call_operand.hbm [shape: f32[128,128], index: 3, kind: input, shape index: {}]   ;;  %s451_s4 = inlined_call_operand.vmem [shape: f32[1,128], index: 4, kind: input, shape index: {}]   ;;  %s452_s5 = inlined_call_operand.hbm [shape: f32[8,128], index: 5, kind: output, shape index: {}]  }
   0x1   :  { %11 = vsyncpa [#allocation4], 0  ;;  %s374_s18 = smov [#allocation2]   ;;  %s326_s22 = scalar_lea.hbm %s450_s3, 2048 }
   0x2   :  { %s23_s19 = sshll.u32 %s374_s18, 4  ;;  %p327_p0 = scmp.ne.s32.totalorder %s450_s3, %s326_s22  ;;  %s24_s19 = int_to_ptr.vmem [resolvable:$true] %s23_s19 }
   0x3   :  { %p330_p1 = scmp.lt.u32.totalorder %s326_s22, %s450_s3 }
   0x5   :  { %p332_p2 = pnand %p330_p1, %p327_p0 }
   0x7   :  { %335 = shalt.err (!%p332_p2)
}
   0x8   :  { %s336_s27 = scalar_lea.vmem %s24_s19, 2048  ;;  %p341_p4 = scmp.lt.s32.totalorder %s24_s19, %s24_s19 }
   0x9   :  { %p337_p3 = scmp.ne.s32.totalorder %s24_s19, %s336_s27  ;;  %p342_p5 = scmp.lt.s32.totalorder %s336_s27, %s336_s27 }
   0xb   :  { %p343_p6 = por %p342_p5, %p341_p4 }
   0xd   :  { %p344_p7 = pnand %p343_p6, %p337_p3 }
   0xf   :  { %347 = shalt.err (!%p344_p7)
}
  0x10   :  { %s375_s28 = smov 128   ;;  %s376_s29 = smov 8  }
  0x11   :  { %29 = dma.hbm_to_vmem [thread:$0]  %s450_s3, 2048, %s24_s19, [#allocation3], %s375_s28, %s375_s28, %s376_s29  }
  0x12   :  { %370 = dma.done.wait [#allocation3], 2048  }
  0x13   :  { %371 = vsyncadd [#allocation3], 4294965248  ;;  %v377_v0 = vmov 0.0   ;;  %vm378_vm0 = vmmov 0   ;;  %v379_v1 = vmov 0.0|0.0   ;;  %vm48_vm1 = vcmask 1043456  }
  0x14   :  { %255 = vmatprep.subr.mxu0 %v377_v0  ;;  %257 = vmatprep.mubr.msk.f32.mxu0 %vm378_vm0, %v377_v0  ;;  %vm44_vm2 = vcmask 31744   ;;  %v36_v2 = vld [vmem:[%s448_s1] sm:$0xf]  ;;  %v124_v5 = vld [vmem:[#allocation2 + $0x8] sm:$0xff]  ;;  %v125_v6 = vld [vmem:[#allocation2 + $0x10] sm:$0xff]  ;;  %s380_s12 = smov [#allocation5]  }
  0x15   :  { %295 = vmatprep.subr.bf16.mxu1 %v379_v1  ;;  %292 = vmatprep.mubr.msk.f32.mxu1 %vm378_vm0, %v377_v0  ;;  %v35_v3 = vld [vmem:[%s447_s0] sm:$0xff]  ;;  %v126_v7 = vld [vmem:[#allocation2 + $0x18] sm:$0xff]  ;;  %v128_v11 = vld [vmem:[#allocation2 + $0x28] sm:$0xff]  ;;  %s223_s13 = sshll.u32 %s380_s12, 4  ;;  %s224_s13 = int_to_ptr.vmem [resolvable:$true] %s223_s13 }
  0x16   :  { %v123_v4 = vld [vmem:[#allocation2] sm:$0xff]  ;;  %256 = vmatpush3.msk.msra.mxu0 %vm48_vm1, %v36_v2  ;;  %v299_v9 = vpack.c.bf16 %v126_v7, %v125_v6  ;;  %v129_v13 = vld [vmem:[#allocation2 + $0x30] sm:$0xff]  ;;  %v130_v14 = vld [vmem:[#allocation2 + $0x38] sm:$0xff]  ;;  %s348_s14 = scalar_lea.vmem %s224_s13, 128  ;;  %p353_p9 = scmp.lt.s32.totalorder %s224_s13, %s224_s13 }
  0x17   :  { %258 = vmatmul.mubr.msk.f32.vlgmr.msra.gmra.mrb[0].mxu0 %vm44_vm2, %v35_v3  ;;  %v296_v8 = vpack.c.bf16 %v124_v5, %v123_v4  ;;  %v127_v10 = vld [vmem:[#allocation2 + $0x20] sm:$0xff]  ;;  %v305_v15 = vpack.c.bf16 %v130_v14, %v129_v13  ;;  %v132_v17 = vld [vmem:[#allocation2 + $0x48] sm:$0xff]  ;;  %v133_v19 = vld [vmem:[#allocation2 + $0x50] sm:$0xff]  ;;  %p349_p8 = scmp.ne.s32.totalorder %s224_s13, %s348_s14  ;;  %p354_p10 = scmp.lt.s32.totalorder %s348_s14, %s348_s14 }
  0x18   :  { %v302_v12 = vpack.c.bf16 %v128_v11, %v127_v10  ;;  %v131_v16 = vld [vmem:[#allocation2 + $0x40] sm:$0xff]  ;;  %v134_v20 = vld [vmem:[#allocation2 + $0x58] sm:$0xff]  ;;  %v136_v23 = vld [vmem:[#allocation2 + $0x68] sm:$0xff] }
  0x19   :  { %297 = vmatpush3.bf16.msra.mxu1 %v296_v8  ;;  %v308_v18 = vpack.c.bf16 %v132_v17, %v131_v16  ;;  %v311_v21 = vpack.c.bf16 %v134_v20, %v133_v19  ;;  %v135_v22 = vld [vmem:[#allocation2 + $0x60] sm:$0xff]  ;;  %v137_v25 = vld [vmem:[#allocation2 + $0x70] sm:$0xff]  ;;  %v138_v26 = vld [vmem:[#allocation2 + $0x78] sm:$0xff]  ;;  %p355_p11 = por %p354_p10, %p353_p9 }
  0x1a   :  { %298 = vmatprep.subr.bf16.mxu1 %v379_v1  ;;  %v314_v24 = vpack.c.bf16 %v136_v23, %v135_v22  ;;  %v317_v27 = vpack.c.bf16 %v138_v26, %v137_v25  ;;  %v232_v28 = vld [vmem:[%s449_s2] ss:$0 sm:$0xff] }
  0x1b   :  { %v235_v33 = vld [vmem:[%s451_s4] ss:$0 sm:$0xff]  ;;  %p356_p12 = pnand %p355_p11, %p349_p8 }
  0x1d   :  { %300 = vmatpush3.bf16.msra.mxu1 %v299_v9 }
  0x1e   :  { %301 = vmatprep.subr.bf16.mxu1 %v379_v1 }
  0x21   :  { %303 = vmatpush3.bf16.msra.mxu1 %v302_v12 }
  0x22   :  { %304 = vmatprep.subr.bf16.mxu1 %v379_v1 }
  0x25   :  { %306 = vmatpush3.bf16.msra.mxu1 %v305_v15 }
  0x26   :  { %307 = vmatprep.subr.bf16.mxu1 %v379_v1 }
  0x29   :  { %309 = vmatpush3.bf16.msra.mxu1 %v308_v18 }
  0x2a   :  { %310 = vmatprep.subr.bf16.mxu1 %v379_v1 }
  0x2d   :  { %312 = vmatpush3.bf16.msra.mxu1 %v311_v21 }
  0x2e   :  { %313 = vmatprep.subr.bf16.mxu1 %v379_v1 }
  0x31   :  { %315 = vmatpush3.bf16.msra.mxu1 %v314_v24 }
  0x32   :  { %316 = vmatprep.subr.bf16.mxu1 %v379_v1 }
  0x35   :  { %318 = vmatpush3.bf16.msra.mxu1 %v317_v27 }
  0xea   :  { %v118_v29 = vpop.f32.mrb[0].mxu0 }
  0xeb   :  { %v119_v30 = vadd.f32 %v232_v28, %v118_v29  ;;  %v259_v31 = vpop.f32.mrb[1].mxu0 }
  0xed   :  { %v122_v32 = vmax.f32 %v119_v30, 0.0 }
  0xef   :  { %293 = vmatmul.mubr.f32.vlgmr.msra.gmra.mrb[0].mxu1 %v122_v32 }
 0x1c2   :  { %v212_v34 = vpop.f32.mrb[0].mxu1 }
 0x1c3   :  { %v213_v35 = vadd.f32 %v235_v33, %v212_v34  ;;  %v294_v36 = vpop.f32.mrb[1].mxu1 }
 0x1c5   :  { %216 = vst [vmem:[#allocation5] sm:$0xff] %v213_v35 }
 0x1c6   :  { %359 = shalt.err (!%p356_p12)
}
 0x1c7   :  { %s360_s16 = scalar_lea.hbm %s452_s5, 128 }
 0x1c8   :  { %p361_p13 = scmp.ne.s32.totalorder %s452_s5, %s360_s16  ;;  %p364_p0 = scmp.lt.u32.totalorder %s360_s16, %s452_s5 }
 0x1ca   :  { %p366_p1 = pnand %p364_p0, %p361_p13 }
 0x1cc   :  { %369 = shalt.err (!%p366_p1)
}
 0x1cd   :  { %226 = dma.vmem_to_hbm [thread:$0]  %s224_s13, 128, %s452_s5, [#allocation4]  }
 0x1ce   :  { %372 = dma.done.wait [#allocation4], 128  }
 0x1cf   :  { %373 = vsyncadd [#allocation4], 4294967168 }
 0x1d0   :  { %230 = vsyncpa [#allocation3], 1 }
 0x1d1   :  { %231 = vsyncpa [#allocation4], 1 }

</bundles_post_ra>
